<compile_context>
chip_gen: v5e
topology: v5e:2x2
jax: 0.10.0
libtpu: 0.0.40
codegen_flags: <defaults>
</compile_context>

<pallas_src>
import functools

import jax
import jax.numpy as jnp
from jax.experimental import pallas as pl
from jax.experimental.pallas import tpu as pltpu


def _point_head_kernel(layer_specs, out_dims, compute_dtype, *refs):
    """refs = (fine, coarse, w_main_0..w_main_{L-1}, [w_coarse_all], bias_all, out).

    Activation tiles are (C, TM) with the sampled points on the lane axis.
      w_main_k     : (Cout_k, Cin_main_k)        compute_dtype
      w_coarse_all : (sum Cout_coarse, n_cls)    compute_dtype (row-stacked, layer order)
      bias_all     : (sum Cout, 1)               float32       (row-stacked, layer order)
    """
    n_layers = len(layer_specs)
    any_coarse = any(hc for hc, _ in layer_specs)

    fine_ref, coarse_ref = refs[0], refs[1]
    w_main_refs = refs[2:2 + n_layers]
    idx = 2 + n_layers
    w_coarse_ref = None
    if any_coarse:
        w_coarse_ref = refs[idx]
        idx += 1
    bias_ref = refs[idx]
    out_ref = refs[idx + 1]

    x = fine_ref[...].astype(compute_dtype)            # (c_fine, TM)
    bias = bias_ref[...]                                # (sum Cout, 1) f32

    coarse_all = None
    if any_coarse:
        coarse = coarse_ref[...].astype(compute_dtype)  # (n_cls, TM)
        # One fused MXU dot produces every layer's coarse contribution.
        coarse_all = jnp.dot(w_coarse_ref[...], coarse,
                             preferred_element_type=jnp.float32)

    c_off = 0
    b_off = 0
    for li, ((has_coarse, apply_relu), cout) in enumerate(zip(layer_specs, out_dims)):
        y = jnp.dot(w_main_refs[li][...], x,
                    preferred_element_type=jnp.float32)     # (cout, TM) f32
        if has_coarse:
            y = y + coarse_all[c_off:c_off + cout, :]
            c_off += cout
        y = y + bias[b_off:b_off + cout, :]                 # f32 bias add
        b_off += cout
        if apply_relu:
            # ReLU in f32, re-cast for the next MXU dot.
            x = jnp.maximum(y, 0.0).astype(compute_dtype)
        else:
            out_ref[...] = y.astype(out_ref.dtype)          # predictor store


def standard_point_head_forward(fine, coarse, params, *, coarse_pred_each_layer,
                                compute_dtype=jnp.bfloat16, tm=2048):
    """fine: (N, C_fine, P); coarse: (N, num_classes, P); params: list of (w, b)
    with w of shape (Cin, Cout) (Conv1d k=1 weight, transposed) and b (Cout,).

    tm is the point-tile width in lanes (multiple of 128).  Default 2048; sweep
    1024-4096 on v6e/v7x, cap around 1024-2048 on v5e (16 MiB scoped VMEM)."""
    N, c_fine, P = fine.shape
    num_classes = coarse.shape[1]
    num_fc = len(params) - 1
    num_mask = int(params[-1][0].shape[1])
    out_dtype = fine.dtype

    # ---- per-layer (uses_coarse, relu) flags, matching the PyTorch forward:
    # layer 0 always consumes coarse (x = cat(fine, coarse)); later FC layers
    # and the predictor consume it iff coarse_pred_each_layer (the predictor
    # also does when there are no FC layers).
    layer_specs = []
    for k in range(num_fc):
        layer_specs.append((k == 0 or coarse_pred_each_layer, True))
    layer_specs.append((coarse_pred_each_layer or num_fc == 0, False))
    layer_specs = tuple(layer_specs)
    any_coarse = any(hc for hc, _ in layer_specs)

    # ---- pack parameters: per-layer main weights, one stacked coarse weight,
    # one stacked f32 bias.  The per-layer concat(x, coarse) becomes two
    # accumulating dots, with all coarse dots fused into a single matmul.
    w_mains, w_coarse_rows, biases, out_dims = [], [], [], []
    prev_out = c_fine
    for li, ((w, b), (has_coarse, _)) in enumerate(zip(params, layer_specs)):
        wt = jnp.asarray(w).T.astype(compute_dtype)          # (Cout, Cin_total)
        cout, cin_total = wt.shape
        cin_main = cin_total - (num_classes if has_coarse else 0)
        # Guard: concat order is cat(x, coarse) -> coarse occupies the last
        # num_classes input channels.
        assert cin_main > 0 and cin_main == prev_out, (
            f"layer {li}: expected main-input dim {prev_out}, got {cin_main}")
        w_mains.append(wt[:, :cin_main])
        if has_coarse:
            w_coarse_rows.append(wt[:, cin_main:])
        biases.append(jnp.asarray(b, jnp.float32).reshape(-1, 1))
        out_dims.append(int(cout))
        prev_out = cout
    out_dims = tuple(out_dims)

    flat_params = list(w_mains)
    if any_coarse:
        flat_params.append(jnp.concatenate(w_coarse_rows, axis=0))
    flat_params.append(jnp.concatenate(biases, axis=0))

    # ---- point tiling: lane tiles, no wrapper-side padding.  The tail tile is
    # handled by Pallas edge masking (each output lane depends only on its own
    # input lane, so garbage OOB lanes never contaminate valid outputs).
    if P >= 128:
        tm = max(128, min((int(tm) // 128) * 128, (P // 128) * 128))
        # v7x: keep >= 2 grid steps so both TensorCores get work.
        while N * pl.cdiv(P, tm) < 2 and tm > 128:
            tm = max(128, ((tm // 2) // 128) * 128)
    else:
        tm = P          # full-extent lane block (legal: equals the array dim)
    grid = (N, pl.cdiv(P, tm))

    in_specs = [
        pl.BlockSpec((None, c_fine, tm), lambda n, i: (n, 0, i)),        # fine tile
        pl.BlockSpec((None, num_classes, tm), lambda n, i: (n, 0, i)),   # coarse tile
    ] + [
        # VMEM-resident params (constant index_map -> fetched once).
        pl.BlockSpec(p.shape, lambda n, i: (0, 0))
        for p in flat_params
    ]
    out_spec = pl.BlockSpec((None, num_mask, tm), lambda n, i: (n, 0, i))

    # ---- VMEM budget: double-buffered streamed tiles + resident params +
    # f32 intermediates, with 2x headroom, clamped to the v7x 64 MiB ceiling.
    tile_bytes = (c_fine + num_classes + num_mask) * tm * 4 * 2
    param_bytes = sum(int(p.size) * p.dtype.itemsize for p in flat_params) * 2
    inter_bytes = (sum(out_dims) + max(out_dims) + c_fine + num_classes) * tm * 4
    vmem_limit = int(min(max(2 * (tile_bytes + param_bytes + inter_bytes),
                             32 * 1024 * 1024), 64 * 1024 * 1024))

    kernel = functools.partial(_point_head_kernel, layer_specs, out_dims,
                               compute_dtype)
    return pl.pallas_call(
        kernel,
        out_shape=jax.ShapeDtypeStruct((N, num_mask, P), out_dtype),
        grid=grid,
        in_specs=in_specs,
        out_specs=out_spec,
        compiler_params=pltpu.CompilerParams(
            dimension_semantics=("parallel", "parallel"),
            vmem_limit_bytes=vmem_limit),
    )(fine, coarse, *flat_params)


def init_params(key, input_channels, num_classes, fc_dim, num_fc,
                coarse_pred_each_layer, cls_agnostic_mask):
    """Deterministic init mirroring StandardPointHead.__init__ (shapes + init style)."""
    params = []
    fc_dim_in = input_channels + num_classes
    for _ in range(num_fc):
        key, sub = jax.random.split(key)
        # c2_msra_fill: kaiming_normal_ (fan_out = out_ch * ksize), bias = 0.
        std = (2.0 / fc_dim) ** 0.5
        w = (std * jax.random.normal(sub, (fc_dim_in, fc_dim))).astype(jnp.float32)
        b = jnp.zeros((fc_dim,), jnp.float32)
        params.append((w, b))
        fc_dim_in = fc_dim
        fc_dim_in += num_classes if coarse_pred_each_layer else 0
    num_mask_classes = 1 if cls_agnostic_mask else num_classes
    key, sub = jax.random.split(key)
    wp = (0.001 * jax.random.normal(sub, (fc_dim_in, num_mask_classes))).astype(jnp.float32)
    bp = jnp.zeros((num_mask_classes,), jnp.float32)
    params.append((wp, bp))
    return params


def reference_forward(fine, coarse, params, *, coarse_pred_each_layer,
                      compute_dtype=jnp.float32):
    """Pure-JAX mirror of the PyTorch forward (Conv1d k=1 == channel matmul).

    bf16 behaviour is EMULATED with a cast round-trip (f32 -> bf16 -> f32)
    before an f32 einsum, so no bf16 x bf16 dot is ever dispatched (some
    backends reject that).  With compute_dtype=float32 this is exactly the
    PyTorch semantics."""
    def cast(v):
        return jnp.asarray(v).astype(compute_dtype).astype(jnp.float32)

    def conv1x1(x, w, b):
        y = jnp.einsum("ncp,cd->ndp", cast(x), cast(w))
        return y + jnp.asarray(b, jnp.float32)[None, :, None]

    x = jnp.concatenate([fine, coarse], axis=1).astype(jnp.float32)
    for (w, b) in params[:-1]:
        x = jnp.maximum(conv1x1(x, w, b), 0.0)
        if coarse_pred_each_layer:
            x = jnp.concatenate([x, coarse.astype(jnp.float32)], axis=1)
    w, b = params[-1]
    return conv1x1(x, w, b)


if __name__ == "__main__":
    # Small config consistent with the module's forward.
    N = 2                    # batch
    P = 256                  # number of sampled points
    input_channels = 4       # fine-grained feature channels
    num_classes = 8          # POINT_HEAD.NUM_CLASSES
    fc_dim = 32              # POINT_HEAD.FC_DIM
    num_fc = 3               # POINT_HEAD.NUM_FC
    coarse_pred_each_layer = True
    cls_agnostic_mask = False

    key = jax.random.PRNGKey(0)
    k_fine, k_coarse, k_params = jax.random.split(key, 3)

    fine = jax.random.normal(k_fine, (N, input_channels, P), jnp.float32)
    coarse = jax.random.normal(k_coarse, (N, num_classes, P), jnp.float32)
    params = init_params(k_params, input_channels, num_classes, fc_dim, num_fc,
                         coarse_pred_each_layer, cls_agnostic_mask)

    out = standard_point_head_forward(
        fine, coarse, params, coarse_pred_each_layer=coarse_pred_each_layer)
    out = jax.block_until_ready(out)

    # Check vs a reference emulating the same bf16 matmul-input rounding.
    ref_bf16 = reference_forward(fine, coarse, params,
                                 coarse_pred_each_layer=coarse_pred_each_layer,
                                 compute_dtype=jnp.bfloat16)
    # Loose sanity check vs the exact f32 PyTorch-semantics reference.
    ref_f32 = reference_forward(fine, coarse, params,
                                coarse_pred_each_layer=coarse_pred_each_layer,
                                compute_dtype=jnp.float32)
    ref_bf16, ref_f32 = jax.block_until_ready((ref_bf16, ref_f32))

    assert out.shape == (N, num_classes, P), out.shape
    assert jnp.allclose(out, ref_bf16, atol=1e-3, rtol=1e-2), "mismatch vs bf16-emulated reference"
    assert jnp.allclose(out, ref_f32, atol=2e-3, rtol=5e-2), "mismatch vs f32 reference"
    print("KERNEL_OK")
</pallas_src>

<mosaic_0001>
module attributes {stable_mosaic.version = 11 : i64} {
  func.func @_point_head_kernel(%arg0: i32, %arg1: i32, %arg2: memref<1x4x256xf32, #tpu.memory_space<vmem>>, %arg3: memref<1x8x256xf32, #tpu.memory_space<vmem>>, %arg4: memref<32x4xbf16, #tpu.memory_space<vmem>>, %arg5: memref<32x32xbf16, #tpu.memory_space<vmem>>, %arg6: memref<32x32xbf16, #tpu.memory_space<vmem>>, %arg7: memref<8x32xbf16, #tpu.memory_space<vmem>>, %arg8: memref<104x8xbf16, #tpu.memory_space<vmem>>, %arg9: memref<104x1xf32, #tpu.memory_space<vmem>>, %arg10: memref<1x8x256xf32, #tpu.memory_space<vmem>>) attributes {dimension_semantics = [#tpu.dimension_semantics<parallel>, #tpu.dimension_semantics<parallel>], iteration_bounds = array<i64: 2, 1>, scalar_prefetch = 0 : i64, scratch_operands = 0 : i64, tpu.core_type = #tpu.core_type<tc>, window_params = [{transform_indices = @transform_0, window_bounds = array<i64: 1, 4, 256>}, {transform_indices = @transform_1, window_bounds = array<i64: 1, 8, 256>}, {pipeline_mode = #tpu.pipeline_mode<synchronous>, transform_indices = @transform_2, window_bounds = array<i64: 32, 4>}, {pipeline_mode = #tpu.pipeline_mode<synchronous>, transform_indices = @transform_3, window_bounds = array<i64: 32, 32>}, {pipeline_mode = #tpu.pipeline_mode<synchronous>, transform_indices = @transform_4, window_bounds = array<i64: 32, 32>}, {pipeline_mode = #tpu.pipeline_mode<synchronous>, transform_indices = @transform_5, window_bounds = array<i64: 8, 32>}, {pipeline_mode = #tpu.pipeline_mode<synchronous>, transform_indices = @transform_6, window_bounds = array<i64: 104, 8>}, {pipeline_mode = #tpu.pipeline_mode<synchronous>, transform_indices = @transform_7, window_bounds = array<i64: 104, 1>}, {transform_indices = @transform_8, window_bounds = array<i64: 1, 8, 256>}]} {
    %c0 = arith.constant 0 : index
    %c0_0 = arith.constant 0 : index
    %c0_1 = arith.constant 0 : index
    %0 = vector.load %arg2[%c0, %c0_0, %c0_1] : memref<1x4x256xf32, #tpu.memory_space<vmem>>, vector<1x4x256xf32>
    %1 = vector.shape_cast %0 : vector<1x4x256xf32> to vector<4x256xf32>
    %2 = arith.truncf %1 : vector<4x256xf32> to vector<4x256xbf16>
    %c0_2 = arith.constant 0 : index
    %c0_3 = arith.constant 0 : index
    %3 = vector.load %arg9[%c0_2, %c0_3] : memref<104x1xf32, #tpu.memory_space<vmem>>, vector<104x1xf32>
    %c0_4 = arith.constant 0 : index
    %c0_5 = arith.constant 0 : index
    %c0_6 = arith.constant 0 : index
    %4 = vector.load %arg3[%c0_4, %c0_5, %c0_6] : memref<1x8x256xf32, #tpu.memory_space<vmem>>, vector<1x8x256xf32>
    %5 = vector.shape_cast %4 : vector<1x8x256xf32> to vector<8x256xf32>
    %6 = arith.truncf %5 : vector<8x256xf32> to vector<8x256xbf16>
    %c0_7 = arith.constant 0 : index
    %c0_8 = arith.constant 0 : index
    %7 = vector.load %arg8[%c0_7, %c0_8] : memref<104x8xbf16, #tpu.memory_space<vmem>>, vector<104x8xbf16>
    %cst = arith.constant dense<0.000000e+00> : vector<104x256xf32>
    %8 = tpu.matmul %7, %6, %cst {dimension_numbers = #tpu.dot_dimension_numbers<[1], [0], [0], [1], [0, 0, 1, 1], [], []>} : vector<104x8xbf16>, vector<8x256xbf16>, vector<104x256xf32> -> vector<104x256xf32>
    %c0_9 = arith.constant 0 : index
    %c0_10 = arith.constant 0 : index
    %9 = vector.load %arg4[%c0_9, %c0_10] : memref<32x4xbf16, #tpu.memory_space<vmem>>, vector<32x4xbf16>
    %cst_11 = arith.constant dense<0.000000e+00> : vector<32x256xf32>
    %10 = tpu.matmul %9, %2, %cst_11 {dimension_numbers = #tpu.dot_dimension_numbers<[1], [0], [0], [1], [0, 0, 1, 1], [], []>} : vector<32x4xbf16>, vector<4x256xbf16>, vector<32x256xf32> -> vector<32x256xf32>
    %11 = vector.extract_strided_slice %8 {offsets = [0, 0], sizes = [32, 256], strides = [1, 1]} : vector<104x256xf32> to vector<32x256xf32>
    %12 = arith.addf %10, %11 : vector<32x256xf32>
    %13 = vector.extract_strided_slice %3 {offsets = [0, 0], sizes = [32, 1], strides = [1, 1]} : vector<104x1xf32> to vector<32x1xf32>
    %14 = vector.broadcast %13 : vector<32x1xf32> to vector<32x256xf32>
    %15 = arith.addf %12, %14 : vector<32x256xf32>
    %cst_12 = arith.constant 0.000000e+00 : f32
    %16 = vector.broadcast %cst_12 : f32 to vector<32x256xf32>
    %17 = arith.maximumf %15, %16 : vector<32x256xf32>
    %18 = arith.truncf %17 : vector<32x256xf32> to vector<32x256xbf16>
    %c0_13 = arith.constant 0 : index
    %c0_14 = arith.constant 0 : index
    %19 = vector.load %arg5[%c0_13, %c0_14] : memref<32x32xbf16, #tpu.memory_space<vmem>>, vector<32x32xbf16>
    %cst_15 = arith.constant dense<0.000000e+00> : vector<32x256xf32>
    %20 = tpu.matmul %19, %18, %cst_15 {dimension_numbers = #tpu.dot_dimension_numbers<[1], [0], [0], [1], [0, 0, 1, 1], [], []>} : vector<32x32xbf16>, vector<32x256xbf16>, vector<32x256xf32> -> vector<32x256xf32>
    %21 = vector.extract_strided_slice %8 {offsets = [32, 0], sizes = [32, 256], strides = [1, 1]} : vector<104x256xf32> to vector<32x256xf32>
    %22 = arith.addf %20, %21 : vector<32x256xf32>
    %23 = vector.extract_strided_slice %3 {offsets = [32, 0], sizes = [32, 1], strides = [1, 1]} : vector<104x1xf32> to vector<32x1xf32>
    %24 = vector.broadcast %23 : vector<32x1xf32> to vector<32x256xf32>
    %25 = arith.addf %22, %24 : vector<32x256xf32>
    %cst_16 = arith.constant 0.000000e+00 : f32
    %26 = vector.broadcast %cst_16 : f32 to vector<32x256xf32>
    %27 = arith.maximumf %25, %26 : vector<32x256xf32>
    %28 = arith.truncf %27 : vector<32x256xf32> to vector<32x256xbf16>
    %c0_17 = arith.constant 0 : index
    %c0_18 = arith.constant 0 : index
    %29 = vector.load %arg6[%c0_17, %c0_18] : memref<32x32xbf16, #tpu.memory_space<vmem>>, vector<32x32xbf16>
    %cst_19 = arith.constant dense<0.000000e+00> : vector<32x256xf32>
    %30 = tpu.matmul %29, %28, %cst_19 {dimension_numbers = #tpu.dot_dimension_numbers<[1], [0], [0], [1], [0, 0, 1, 1], [], []>} : vector<32x32xbf16>, vector<32x256xbf16>, vector<32x256xf32> -> vector<32x256xf32>
    %31 = vector.extract_strided_slice %8 {offsets = [64, 0], sizes = [32, 256], strides = [1, 1]} : vector<104x256xf32> to vector<32x256xf32>
    %32 = arith.addf %30, %31 : vector<32x256xf32>
    %33 = vector.extract_strided_slice %3 {offsets = [64, 0], sizes = [32, 1], strides = [1, 1]} : vector<104x1xf32> to vector<32x1xf32>
    %34 = vector.broadcast %33 : vector<32x1xf32> to vector<32x256xf32>
    %35 = arith.addf %32, %34 : vector<32x256xf32>
    %cst_20 = arith.constant 0.000000e+00 : f32
    %36 = vector.broadcast %cst_20 : f32 to vector<32x256xf32>
    %37 = arith.maximumf %35, %36 : vector<32x256xf32>
    %38 = arith.truncf %37 : vector<32x256xf32> to vector<32x256xbf16>
    %c0_21 = arith.constant 0 : index
    %c0_22 = arith.constant 0 : index
    %39 = vector.load %arg7[%c0_21, %c0_22] : memref<8x32xbf16, #tpu.memory_space<vmem>>, vector<8x32xbf16>
    %cst_23 = arith.constant dense<0.000000e+00> : vector<8x256xf32>
    %40 = tpu.matmul %39, %38, %cst_23 {dimension_numbers = #tpu.dot_dimension_numbers<[1], [0], [0], [1], [0, 0, 1, 1], [], []>} : vector<8x32xbf16>, vector<32x256xbf16>, vector<8x256xf32> -> vector<8x256xf32>
    %41 = vector.extract_strided_slice %8 {offsets = [96, 0], sizes = [8, 256], strides = [1, 1]} : vector<104x256xf32> to vector<8x256xf32>
    %42 = arith.addf %40, %41 : vector<8x256xf32>
    %43 = vector.extract_strided_slice %3 {offsets = [96, 0], sizes = [8, 1], strides = [1, 1]} : vector<104x1xf32> to vector<8x1xf32>
    %44 = vector.broadcast %43 : vector<8x1xf32> to vector<8x256xf32>
    %45 = arith.addf %42, %44 : vector<8x256xf32>
    %c0_24 = arith.constant 0 : index
    %c0_25 = arith.constant 0 : index
    %c0_26 = arith.constant 0 : index
    %46 = vector.load %arg10[%c0_24, %c0_25, %c0_26] : memref<1x8x256xf32, #tpu.memory_space<vmem>>, vector<1x8x256xf32>
    %47 = vector.shape_cast %46 : vector<1x8x256xf32> to vector<8x256xf32>
    %48 = vector.shape_cast %45 : vector<8x256xf32> to vector<1x8x256xf32>
    tpu.vector_store %arg10[%c0_24, %c0_25, %c0_26], %48 {strides = array<i32>} : memref<1x8x256xf32, #tpu.memory_space<vmem>>, vector<1x8x256xf32>,
    return
  }
  func.func @transform_0(%arg0: i32, %arg1: i32) -> (i32, i32, i32) {
    %c0_i32 = arith.constant 0 : i32
    %c0_i32_0 = arith.constant 0 : i32
    return %arg0, %c0_i32, %arg1 : i32, i32, i32
  }
  func.func @transform_1(%arg0: i32, %arg1: i32) -> (i32, i32, i32) {
    %c0_i32 = arith.constant 0 : i32
    %c0_i32_0 = arith.constant 0 : i32
    return %arg0, %c0_i32, %arg1 : i32, i32, i32
  }
  func.func @transform_2(%arg0: i32, %arg1: i32) -> (i32, i32) {
    %c0_i32 = arith.constant 0 : i32
    %c0_i32_0 = arith.constant 0 : i32
    %c0_i32_1 = arith.constant 0 : i32
    return %c0_i32, %c0_i32_0 : i32, i32
  }
  func.func @transform_3(%arg0: i32, %arg1: i32) -> (i32, i32) {
    %c0_i32 = arith.constant 0 : i32
    %c0_i32_0 = arith.constant 0 : i32
    %c0_i32_1 = arith.constant 0 : i32
    return %c0_i32, %c0_i32_0 : i32, i32
  }
  func.func @transform_4(%arg0: i32, %arg1: i32) -> (i32, i32) {
    %c0_i32 = arith.constant 0 : i32
    %c0_i32_0 = arith.constant 0 : i32
    %c0_i32_1 = arith.constant 0 : i32
    return %c0_i32, %c0_i32_0 : i32, i32
  }
  func.func @transform_5(%arg0: i32, %arg1: i32) -> (i32, i32) {
    %c0_i32 = arith.constant 0 : i32
    %c0_i32_0 = arith.constant 0 : i32
    %c0_i32_1 = arith.constant 0 : i32
    return %c0_i32, %c0_i32_0 : i32, i32
  }
  func.func @transform_6(%arg0: i32, %arg1: i32) -> (i32, i32) {
    %c0_i32 = arith.constant 0 : i32
    %c0_i32_0 = arith.constant 0 : i32
    %c0_i32_1 = arith.constant 0 : i32
    return %c0_i32, %c0_i32_0 : i32, i32
  }
  func.func @transform_7(%arg0: i32, %arg1: i32) -> (i32, i32) {
    %c0_i32 = arith.constant 0 : i32
    %c0_i32_0 = arith.constant 0 : i32
    %c0_i32_1 = arith.constant 0 : i32
    return %c0_i32, %c0_i32_0 : i32, i32
  }
  func.func @transform_8(%arg0: i32, %arg1: i32) -> (i32, i32, i32) {
    %c0_i32 = arith.constant 0 : i32
    %c0_i32_0 = arith.constant 0 : i32
    return %arg0, %c0_i32, %arg1 : i32, i32, i32
  }
}

</mosaic_0001>

<bundles_post_ra>
// kernel: tpu_custom_call.1
= control target key start
LH: loop header
LB: loop body
LE: loop exit
PB: predicated region body
PF: predicated region fallthrough
CT: control target
= control target key end

     0   :  { %13 = vsyncpa [#allocation3], 0  ;;  %s1514_s0 = inlined_call_operand.vmem [shape: f32[2,4,256], index: 0, kind: input, shape index: {}]   ;;  %s1515_s1 = inlined_call_operand.vmem [shape: f32[2,8,256], index: 1, kind: input, shape index: {}]   ;;  %s1516_s2 = inlined_call_operand.vmem [shape: bf16[32,4], index: 2, kind: input, shape index: {}]   ;;  %s1517_s3 = inlined_call_operand.vmem [shape: bf16[32,32], index: 3, kind: input, shape index: {}]   ;;  %s1518_s4 = inlined_call_operand.vmem [shape: bf16[32,32], index: 4, kind: input, shape index: {}]   ;;  %s1519_s5 = inlined_call_operand.vmem [shape: bf16[8,32], index: 5, kind: input, shape index: {}]   ;;  %s1520_s6 = inlined_call_operand.vmem [shape: bf16[104,8], index: 6, kind: input, shape index: {}]   ;;  %s1521_s7 = inlined_call_operand.vmem [shape: f32[104,1], index: 7, kind: input, shape index: {}]   ;;  %s1522_s8 = inlined_call_operand.hbm [shape: f32[2,8,256], index: 8, kind: output, shape index: {}]  }
   0x1   :  { %15 = vsyncpa [#allocation3 + $0x1], 0  ;;  %s1305_s27 = smov 0   ;;  %s1307_s28 = smov 0  }
   0x2   :  { %s1309_s29 = smov 0   ;;  %s1311_s30 = smov 0  }
   0x3   :  { %s1313_s9 = smov 0   ;;  %s1315_s10 = smov 0  }
   0x4 LB: > { %s1014_s11 = sadd.s32 4294967295, %s1257_s10   ;;  %s1015_s12 = sadd.s32 4294967294, %s1257_s10   ;;  %s1257_s10 = sphi %s1315_s10, %s21_s10   ;;  %s1253_s9 = sphi %s1313_s9, %s1529_s9   ;;  %s1249_s30 = sphi %s1311_s30, %s1528_s30   ;;  %s1245_s29 = sphi %s1309_s29, %s1527_s29   ;;  %s1241_s28 = sphi %s1307_s28, %s1526_s28   ;;  %s1237_s27 = sphi %s1305_s27, %s1525_s27  }
   0x5   : > { %s33_s13 = sadd.s32 1, %s1253_s9  ;;  %s224_s14 = sadd.s32 1, %s1245_s29 }
   0x6   : > { %p35_p0 = scmp.ge.s32.totalorder %s33_s13, 2  ;;  %p234_p1 = scmp.ne.s32.totalorder %s1245_s29, %s1241_s28 }
   0x7   : > { %p235_p2 = scmp.eq.s32.totalorder %s1014_s11, 1  ;;  %p240_p3 = scmp.ne.s32.totalorder %s1241_s28, %s1237_s27 }
   0x8   : > { %s1531_s13 = smov (%p35_p0, %s33_s13), 0  ;;  %p241_p5 = scmp.eq.s32.totalorder %s1015_s12, 1 }
   0x9   : > { %p1345_p4 = por %p235_p2, %p234_p1  ;;  %s219_s16 = ssub.s32 %s1253_s9, %s1531_s13 }
   0xa   : > { %p1018_p6 = scmp.ge.s32.totalorder %s1257_s10, 1  ;;  %p222_p7 = scmp.eq.s32.totalorder %s219_s16, 0 }
   0xb   : > { %p1352_p8 = por %p241_p5, %p240_p3  ;;  %p303_p9 = scmp.lt.s32.totalorder %s1257_s10, 3 }
   0xc   : > { %s1358_s18 = scalar_select %p222_p7, %s1245_s29, %s224_s14  }
   0xd   : > { %p304_p10 = pnand %p1018_p6, %p303_p9 }
   0xe   : > { %p351_p11 = scmp.lt.s32.totalorder (!%p304_p10), %s1249_s30, 1 }
   0xf   : > { %307 = sbr.rel (%p304_p10) target bundleno = 692 (0x2b4), region = 52 }
  0x14   : > { %v383_v0 = vld [vmem:[%s1521_s7 + $0x10] sm:$0xff]  ;;  %s352_s21 = scalar_select %p351_p11, %s1249_s30, 1  ;;  %v1259_v1 = vmov 0   ;;  %v381_v2 = vld [vmem:[%s1521_s7] sm:$0xff]  ;;  %vm466_vm0 = vcmask 1043456   ;;  %v384_v8 = vld [vmem:[%s1521_s7 + $0x18] sm:$0xff] }
  0x15   : > { %1176 = vset.pattern.permute.xlu0 %v1259_v1  ;;  %1177 = vset.pattern.permute.xlu1 %v1259_v1  ;;  %v382_v9 = vld [vmem:[%s1521_s7 + $0x8] sm:$0xff]  ;;  %v1107_v12 = vld [vmem:[%s1520_s6] sm:$0xff]  ;;  %vm444_vm1 = vcmask 64512   ;;  %vm580_vm2 = vcmask 1041408   ;;  %vm573_vm3 = vcmask 31744   ;;  %v392_v22 = vld [vmem:[%s1521_s7 + $0x58] sm:$0xff] }
  0x16   : > { %637 = vperm.xlu0 %1176, %v383_v0   ;;  %627 = vperm.xlu1 %1177, %v381_v2   ;;  %s1105_s24 = sshll.u32 %s352_s21, 3  ;;  %s1106_s25 = sshll.u32 %s352_s21, 4  ;;  %v385_v17 = vld [vmem:[%s1521_s7 + $0x20] sm:$0xff]  ;;  %v386_v18 = vld [vmem:[%s1521_s7 + $0x28] sm:$0xff]  ;;  %v1109_v33 = vld [vmem:[%s1520_s6 + $0x10] sm:$0xff]  ;;  %vm679_vm4 = vcmask 261120  }
  0x17   : > { %1178 = vset.pattern.permute.xlu2 %v1259_v1  ;;  %s358_s12 = scalar_lea.vmem %s1514_s0, %s1105_s24  ;;  %s368_s19 = scalar_lea.vmem %s1515_s1, %s1106_s25  ;;  %v1113_v21 = vld [vmem:[%s1516_s2] sm:$0xff]  ;;  %v1108_v24 = vld [vmem:[%s1520_s6 + $0x8] sm:$0xff]  ;;  %v1110_v42 = vld [vmem:[%s1520_s6 + $0x18] sm:$0xff] }
  0x18   : > { %v372_v3 = vld [vmem:[%s358_s12] sm:$0xff]  ;;  %v395_v5 = vld [vmem:[%s368_s19 + $0x8] sm:$0xff]  ;;  %v387_v53 = vld [vmem:[%s1521_s7 + $0x30] sm:$0xff]  ;;  %s347_s21 = sand.u32 1, %s1241_s28   ;;  %s1119_s24 = sshll.u32 %s1249_s30, 4 }
  0x19   : > { %v394_v4 = vld [vmem:[%s368_s19] sm:$0xff]  ;;  %374 = vst [vmem:[#allocation1] ss:$2 sm:$0xff] %v372_v3  ;;  %v397_v7 = vpack.c.bf16 %v395_v5, %v395_v5  ;;  %v1114_v26 = vld [vmem:[%s1516_s2 + $0x8] sm:$0xff]  ;;  %736 = vperm.xlu2 %1178, %v387_v53   ;;  %s1019_s23 = sshll.u32 %s347_s21, 4  ;;  %s915_s11 = scalar_lea.hbm %s1522_s8, %s1119_s24 }
  0x1a   : > { %v396_v6 = vpack.c.bf16 %v394_v4, %v394_v4  ;;  %v389_v23 = vld [vmem:[%s1521_s7 + $0x40] sm:$0xff]  ;;  %s349_s12 = scalar_lea.vmem [#allocation2], %s1019_s23  ;;  %s919_s16 = sshll.u32 %s915_s11, 4  ;;  %s920_s16 = int_to_ptr.hbm [resolvable:$true] %s919_s16 }
  0x1b   : > { %v471_v11 = vsel %vm466_vm0, %v397_v7, 0  ;;  %v393_v25 = vld [vmem:[%s1521_s7 + $0x60] sm:$0xff]  ;;  %s917_s14 = sshll.u32 %s349_s12, 4  ;;  %s902_s30 = scalar_lea.sflag [#allocation3], %s347_s21  ;;  %s918_s14 = int_to_ptr.vmem [resolvable:$true] %s917_s14 }
  0x1c   : > { %v468_v10 = vsel %vm466_vm0, %v396_v6, 0  ;;  %523 = vmatpush.bf16.msra.mxu1 %v471_v11  ;;  %s1193_s19 = sshra.s32 %s920_s16, 4  ;;  %s1199_s23 = scalar_lea.hbm %s1522_s8, 32  ;;  %s1194_s19 = int_to_ptr.hbm [resolvable:$true] %s1193_s19 }
  0x1d   : > { %480 = vmatpush.bf16.msra.mxu0 %v468_v10  ;;  %v388_v10 = vld [vmem:[%s1521_s7 + $0x38] sm:$0xff]  ;;  %s1195_s20 = scalar_lea.hbm %s1194_s19, 16  ;;  %p1200_p1 = scmp.lt.s32.totalorder %s1194_s19, %s1522_s8 }
  0x1e   : > { %642 = vperm.xlu0 %1176, %v384_v8   ;;  %632 = vperm.xlu1 %1177, %v382_v9   ;;  %p1196_p12 = scmp.ne.s32.totalorder %s1194_s19, %s1195_s20  ;;  %p1201_p2 = scmp.lt.s32.totalorder %s1199_s23, %s1195_s20 }
  0x1f   : > { %1055 = vmatmul.msk.bf16.vlgmr.msra.gmra.mxu1 %vm444_vm1, %v1107_v12 }
  0x20   : > { %1048 = vmatmul.msk.bf16.vlgmr.msra.gmra.mxu0 %vm444_vm1, %v1107_v12  ;;  %v375_v13 = vld.sshfl [vmem:[#allocation1] sm:$0xff pattern:$0x75316420]  ;;  %v376_v14 = vld.sshfl [vmem:[#allocation1 + $0x8] sm:$0xff pattern:$0x75316420]  ;;  %p1197_p13 = pnand %p1196_p12, %p1345_p4  ;;  %p1202_p3 = por %p1201_p2, %p1200_p1 }
  0x21   : > { %v379_v15 = vpack.c.bf16 %v375_v13, %v375_v13  ;;  %v380_v16 = vpack.c.bf16 %v376_v14, %v376_v14  ;;  %741 = vperm.xlu2 %1178, %v388_v10  }
  0x22   : > { %p1198_p0 = pneg %p1197_p13 }
  0x23   : > { %v582_v19 = vsel %vm580_vm2, %v379_v15, 0  ;;  %v585_v20 = vsel %vm580_vm2, %v380_v16, 0  ;;  %v1115_v15 = vld [vmem:[%s1517_s3] sm:$0xff]  ;;  %v391_v16 = vld [vmem:[%s1521_s7 + $0x50] sm:$0xff] }
  0x24   : > { %594 = vmatpush.bf16.msra.mxu2 %v582_v19  ;;  %613 = vmatpush.bf16.msra.mxu3 %v585_v20  ;;  %p1203_p5 = pnand %p1202_p3, %p1198_p0 }
  0x26   : > { %726 = vperm.xlu0 %1176, %v385_v17   ;;  %731 = vperm.xlu1 %1177, %v386_v18   ;;  %v390_v17 = vld [vmem:[%s1521_s7 + $0x48] sm:$0xff] }
  0x27   : > { %1070 = vmatmul.msk.bf16.vlgmr.msra.gmra.mxu2 %vm573_vm3, %v1113_v21  ;;  %1072 = vmatmul.msk.bf16.vlgmr.msra.gmra.mxu3 %vm573_vm3, %v1113_v21  ;;  %v1116_v18 = vld [vmem:[%s1517_s3 + $0x8] sm:$0xff] }
  0x29   : > { %834 = vperm.xlu2 %1178, %v391_v16  }
  0x2e   : > { %839 = vperm.xlu0 %1176, %v392_v22   ;;  %824 = vperm.xlu1 %1177, %v389_v23  }
  0x2f   : > { %1056 = vmatmul.msk.bf16.gmra.mxu1 %vm444_vm1, %v1108_v24 }
  0x30   : > { %1049 = vmatmul.msk.bf16.gmra.mxu0 %vm444_vm1, %v1108_v24 }
  0x31   : > { %829 = vperm.xlu2 %1178, %v390_v17  }
  0x36   : > { %894 = vperm.xlu0 %1176, %v393_v25   ;;  %v1111_v25 = vld [vmem:[%s1520_s6 + $0x20] sm:$0xff] }
  0x37   : > { %1071 = vmatmul.msk.bf16.gmra.mxu2 %vm573_vm3, %v1114_v26  ;;  %1073 = vmatmul.msk.bf16.gmra.mxu3 %vm573_vm3, %v1114_v26 }
  0x3f   : > { %1057 = vmatmul.msk.bf16.gmra.mxu1 %vm444_vm1, %v1109_v33 }
  0x40   : > { %1050 = vmatmul.msk.bf16.gmra.mxu0 %vm444_vm1, %v1109_v33  ;;  %v1112_v33 = vld [vmem:[%s1520_s6 + $0x28] sm:$0xff] }
  0x4f   : > { %1058 = vmatmul.msk.bf16.gmra.mxu1 %vm444_vm1, %v1110_v42 }
  0x50   : > { %1051 = vmatmul.msk.bf16.gmra.mxu0 %vm444_vm1, %v1110_v42 }
  0x5f   : > { %1059 = vmatmul.msk.bf16.gmra.mxu1 %vm444_vm1, %v1111_v25 }
  0x60   : > { %1052 = vmatmul.msk.bf16.gmra.mxu0 %vm444_vm1, %v1111_v25 }
  0x6f   : > { %1060 = vmatmul.msk.bf16.gmra.mxu1 %vm444_vm1, %v1112_v33 }
  0x70   : > { %1053 = vmatmul.msk.bf16.gmra.mxu0 %vm444_vm1, %v1112_v33 }
  0x88   : > { %v638_v38 = vpop.permute.xlu0 %637  ;;  %v628_v39 = vpop.permute.xlu1 %627 }
  0x90   : > { %v643_v58 = vpop.permute.xlu0 %642  ;;  %v633_v59 = vpop.permute.xlu1 %632 }
  0x9c   : > { %v525_v28 = vpop.f32.mrf.mxu1 }
  0x9d   : > { %v482_v27 = vpop.f32.mrf.mxu0 }
  0xa4   : > { %v527_v32 = vpop.f32.mrf.mxu1 }
  0xa5   : > { %v484_v31 = vpop.f32.mrf.mxu0 }
  0xaa   : > { %v596_v29 = vpop.f32.mrf.mxu2  ;;  %v615_v30 = vpop.f32.mrf.mxu3 }
  0xab   : > { %v597_v49 = vadd.f32 %v596_v29, %v482_v27  ;;  %v616_v50 = vadd.f32 %v615_v30, %v525_v28  ;;  %v737_v30 = vpop.permute.xlu2 %736 }
  0xac   : > { %v530_v37 = vpop.f32.mrf.mxu1 }
  0xad   : > { %v487_v36 = vpop.f32.mrf.mxu0  ;;  %v645_v0 = vadd.f32 %v628_v39, %v597_v49  ;;  %v646_v1 = vadd.f32 %v628_v39, %v616_v50  ;;  %v727_v50 = vpop.permute.xlu0 %726 }
  0xaf   : > { %v653_v11 = vmax.f32 %v645_v0, 0.0  ;;  %v654_v12 = vmax.f32 %v646_v1, 0.0 }
  0xb2   : > { %v598_v34 = vpop.f32.mrf.mxu2  ;;  %v617_v35 = vpop.f32.mrf.mxu3 }
  0xb3   : > { %v599_v45 = vadd.f32 %v598_v34, %v484_v31  ;;  %v618_v46 = vadd.f32 %v617_v35, %v527_v32  ;;  %v742_v49 = vpop.permute.xlu2 %741 }
  0xb4   : > { %v532_v48 = vpop.f32.mrf.mxu1 }
  0xb5   : > { %v489_v47 = vpop.f32.mrf.mxu0  ;;  %v647_v60 = vadd.f32 %v633_v59, %v599_v45  ;;  %v648_v61 = vadd.f32 %v633_v59, %v618_v46 }
  0xb7   : > { %v655_v6 = vmax.f32 %v647_v60, 0.0  ;;  %v656_v7 = vmax.f32 %v648_v61, 0.0 }
  0xb9   : > { %v661_v13 = vpack.c.bf16 %v655_v6, %v653_v11  ;;  %v662_v14 = vpack.c.bf16 %v656_v7, %v654_v12  ;;  %v1118_v6 = vld [vmem:[%s1518_s4 + $0x8] sm:$0xff]  ;;  %v410_v11 = vld [vmem:[%s1520_s6 + $0x30] sm:$0xf] }
  0xba   : > { %v601_v40 = vpop.f32.mrf.mxu2  ;;  %v620_v41 = vpop.f32.mrf.mxu3  ;;  %v436_v12 = vunpack.c.l.b16 %v410_v11 }
  0xbb   : > { %v602_v43 = vadd.f32 %v601_v40, %v487_v36  ;;  %v621_v44 = vadd.f32 %v620_v41, %v530_v37 }
  0xbc   : > { %v535_v20 = vpop.f32.mrf.mxu1 }
  0xbd   : > { %v649_v54 = vadd.f32 %v638_v38, %v602_v43  ;;  %v650_v55 = vadd.f32 %v638_v38, %v621_v44  ;;  %v492_v19 = vpop.f32.mrf.mxu0 }
  0xbf   : > { %v657_v2 = vmax.f32 %v649_v54, 0.0  ;;  %v658_v3 = vmax.f32 %v650_v55, 0.0 }
  0xc2   : > { %v603_v51 = vpop.f32.mrf.mxu2  ;;  %v622_v52 = vpop.f32.mrf.mxu3 }
  0xc3   : > { %v604_v56 = vadd.f32 %v603_v51, %v489_v47  ;;  %v623_v57 = vadd.f32 %v622_v52, %v532_v48  ;;  %v732_v48 = vpop.permute.xlu1 %731 }
  0xc4   : > { %v537_v24 = vpop.f32.mrf.mxu1 }
  0xc5   : > { %v651_v62 = vadd.f32 %v643_v58, %v604_v56  ;;  %v652_v63 = vadd.f32 %v643_v58, %v623_v57  ;;  %v494_v23 = vpop.f32.mrf.mxu0 }
  0xc7   : > { %v659_v4 = vmax.f32 %v651_v62, 0.0  ;;  %v660_v5 = vmax.f32 %v652_v63, 0.0 }
  0xc9   : > { %v663_v8 = vpack.c.bf16 %v659_v4, %v657_v2  ;;  %v664_v9 = vpack.c.bf16 %v660_v5, %v658_v3  ;;  %v1117_v5 = vld [vmem:[%s1518_s4] sm:$0xff] }
  0xcb   : > { %692 = vmatpush.bf16.msrb.mxu2 %v663_v8  ;;  %711 = vmatpush.bf16.msrb.mxu3 %v664_v9 }
  0xcc   : > { %v540_v29 = vpop.f32.mrf.mxu1 }
  0xcd   : > { %v497_v28 = vpop.f32.mrf.mxu0 }
  0xcf   : > { %693 = vmatpush.bf16.msrb.mxu2 %v661_v13  ;;  %712 = vmatpush.bf16.msrb.mxu3 %v662_v14 }
  0xd2   : > { %1082 = vmatmul.msk.bf16.vlgmr.msrb.gmra.mxu2 %vm679_vm4, %v1115_v15  ;;  %1084 = vmatmul.msk.bf16.vlgmr.msrb.gmra.mxu3 %vm679_vm4, %v1115_v15  ;;  %v443_v15 = vpack.c.b16 %v436_v12, %v436_v12 }
  0xd4   : > { %v542_v39 = vpop.f32.mrf.mxu1  ;;  %1054 = vmatmul.msk.bf16.gmra.mxu0 %vm444_vm1, %v443_v15  ;;  %1061 = vmatmul.msk.bf16.gmra.mxu1 %vm444_vm1, %v443_v15 }
  0xd5   : > { %v499_v38 = vpop.f32.mrf.mxu0 }
  0xdc   : > { %v545_v8 = vpop.f32.mrf.mxu1 }
  0xdd   : > { %v502_v7 = vpop.f32.mrf.mxu0 }
  0xe2   : > { %1083 = vmatmul.msk.bf16.gmra.mxu2 %vm679_vm4, %v1116_v18  ;;  %1085 = vmatmul.msk.bf16.gmra.mxu3 %vm679_vm4, %v1116_v18 }
  0xe4   : > { %v547_v14 = vpop.f32.mrf.mxu1 }
  0xe5   : > { %v504_v13 = vpop.f32.mrf.mxu0 }
  0xed   : > { %v507_v18 = vpop.f32.mrf.mxu0 }
 0x155   : > { %v695_v21 = vpop.f32.mrf.mxu2  ;;  %v714_v22 = vpop.f32.mrf.mxu3 }
 0x156   : > { %v696_v40 = vadd.f32 %v695_v21, %v492_v19  ;;  %v715_v41 = vadd.f32 %v714_v22, %v535_v20  ;;  %v550_v19 = vpop.f32.mrf.mxu1  ;;  %v835_v20 = vpop.permute.xlu2 %834 }
 0x158   : > { %v744_v55 = vadd.f32 %v727_v50, %v696_v40  ;;  %v745_v56 = vadd.f32 %v727_v50, %v715_v41 }
 0x15a   : > { %v752_v1 = vmax.f32 %v744_v55, 0.0  ;;  %v753_v2 = vmax.f32 %v745_v56, 0.0 }
 0x15d   : > { %v697_v26 = vpop.f32.mrf.mxu2  ;;  %v716_v27 = vpop.f32.mrf.mxu3 }
 0x15e   : > { %v698_v36 = vadd.f32 %v697_v26, %v494_v23  ;;  %v717_v37 = vadd.f32 %v716_v27, %v537_v24  ;;  %v509_v27 = vpop.f32.mrf.mxu0 }
 0x160   : > { %v746_v51 = vadd.f32 %v732_v48, %v698_v36  ;;  %v747_v52 = vadd.f32 %v732_v48, %v717_v37  ;;  %v840_v37 = vpop.permute.xlu0 %839 }
 0x162   : > { %v754_v61 = vmax.f32 %v746_v51, 0.0  ;;  %v755_v62 = vmax.f32 %v747_v52, 0.0 }
 0x164   : > { %v760_v3 = vpack.c.bf16 %v754_v61, %v752_v1  ;;  %v761_v4 = vpack.c.bf16 %v755_v62, %v753_v2 }
 0x165   : > { %v700_v31 = vpop.f32.mrf.mxu2  ;;  %v719_v32 = vpop.f32.mrf.mxu3 }
 0x166   : > { %v701_v34 = vadd.f32 %v700_v31, %v497_v28  ;;  %v720_v35 = vadd.f32 %v719_v32, %v540_v29  ;;  %v552_v28 = vpop.f32.mrf.mxu1 }
 0x168   : > { %v748_v44 = vadd.f32 %v737_v30, %v701_v34  ;;  %v749_v45 = vadd.f32 %v737_v30, %v720_v35 }
 0x16a   : > { %v756_v57 = vmax.f32 %v748_v44, 0.0  ;;  %v757_v58 = vmax.f32 %v749_v45, 0.0 }
 0x16d   : > { %v702_v42 = vpop.f32.mrf.mxu2  ;;  %v721_v43 = vpop.f32.mrf.mxu3 }
 0x16e   : > { %v703_v46 = vadd.f32 %v702_v42, %v499_v38  ;;  %v722_v47 = vadd.f32 %v721_v43, %v542_v39  ;;  %v830_v38 = vpop.permute.xlu2 %829  ;;  %v825_v39 = vpop.permute.xlu1 %824 }
 0x170   : > { %v750_v53 = vadd.f32 %v742_v49, %v703_v46  ;;  %v751_v54 = vadd.f32 %v742_v49, %v722_v47 }
 0x172   : > { %v758_v59 = vmax.f32 %v750_v53, 0.0  ;;  %v759_v60 = vmax.f32 %v751_v54, 0.0 }
 0x174   : > { %v762_v63 = vpack.c.bf16 %v758_v59, %v756_v57  ;;  %v763_v0 = vpack.c.bf16 %v759_v60, %v757_v58  ;;  %v862_v58 = vld [vmem:[%s1519_s5] sm:$0xf]  ;;  %v512_v59 = vpop.f32.mrf.mxu0  ;;  %v555_v60 = vpop.f32.mrf.mxu1 }
 0x176   : > { %790 = vmatpush.bf16.msra.mxu2 %v762_v63  ;;  %809 = vmatpush.bf16.msra.mxu3 %v763_v0 }
 0x17a   : > { %791 = vmatpush.bf16.msra.mxu2 %v760_v3  ;;  %810 = vmatpush.bf16.msra.mxu3 %v761_v4  ;;  %v895_v3 = vpop.permute.xlu0 %894 }
 0x17c   : > { %v514_v61 = vpop.f32.mrf.mxu0  ;;  %v557_v62 = vpop.f32.mrf.mxu1 }
 0x17d   : > { %1094 = vmatmul.msk.bf16.vlgmr.msra.gmra.mxu2 %vm679_vm4, %v1117_v5  ;;  %1096 = vmatmul.msk.bf16.vlgmr.msra.gmra.mxu3 %vm679_vm4, %v1117_v5 }
 0x18d   : > { %1095 = vmatmul.msk.bf16.gmra.mxu2 %vm679_vm4, %v1118_v6  ;;  %1097 = vmatmul.msk.bf16.gmra.mxu3 %vm679_vm4, %v1118_v6 }
 0x200   : > { %v793_v9 = vpop.f32.mrf.mxu2  ;;  %v812_v10 = vpop.f32.mrf.mxu3 }
 0x201   : > { %v794_v29 = vadd.f32 %v793_v9, %v502_v7  ;;  %v813_v30 = vadd.f32 %v812_v10, %v545_v8 }
 0x203   : > { %v842_v44 = vadd.f32 %v825_v39, %v794_v29  ;;  %v843_v45 = vadd.f32 %v825_v39, %v813_v30 }
 0x205   : > { %v850_v54 = vmax.f32 %v842_v44, 0.0  ;;  %v851_v55 = vmax.f32 %v843_v45, 0.0 }
 0x208   : > { %v795_v16 = vpop.f32.mrf.mxu2  ;;  %v814_v17 = vpop.f32.mrf.mxu3 }
 0x209   : > { %v796_v25 = vadd.f32 %v795_v16, %v504_v13  ;;  %v815_v26 = vadd.f32 %v814_v17, %v547_v14 }
 0x20b   : > { %v844_v40 = vadd.f32 %v830_v38, %v796_v25  ;;  %v845_v41 = vadd.f32 %v830_v38, %v815_v26 }
 0x20d   : > { %v852_v50 = vmax.f32 %v844_v40, 0.0  ;;  %v853_v51 = vmax.f32 %v845_v41, 0.0 }
 0x20f   : > { %v858_v56 = vpack.c.bf16 %v852_v50, %v850_v54  ;;  %v859_v57 = vpack.c.bf16 %v853_v51, %v851_v55 }
 0x210   : > { %v798_v21 = vpop.f32.mrf.mxu2  ;;  %v817_v22 = vpop.f32.mrf.mxu3 }
 0x211   : > { %v799_v23 = vadd.f32 %v798_v21, %v507_v18  ;;  %v818_v24 = vadd.f32 %v817_v22, %v550_v19 }
 0x213   : > { %v846_v33 = vadd.f32 %v835_v20, %v799_v23  ;;  %v847_v34 = vadd.f32 %v835_v20, %v818_v24 }
 0x215   : > { %v854_v46 = vmax.f32 %v846_v33, 0.0  ;;  %v855_v47 = vmax.f32 %v847_v34, 0.0 }
 0x218   : > { %v800_v31 = vpop.f32.mrf.mxu2  ;;  %v819_v32 = vpop.f32.mrf.mxu3 }
 0x219   : > { %v801_v35 = vadd.f32 %v800_v31, %v509_v27  ;;  %v820_v36 = vadd.f32 %v819_v32, %v552_v28 }
 0x21b   : > { %v848_v42 = vadd.f32 %v840_v37, %v801_v35  ;;  %v849_v43 = vadd.f32 %v840_v37, %v820_v36 }
 0x21d   : > { %v856_v48 = vmax.f32 %v848_v42, 0.0  ;;  %v857_v49 = vmax.f32 %v849_v43, 0.0 }
 0x21f   : > { %v860_v52 = vpack.c.bf16 %v856_v48, %v854_v46  ;;  %v861_v53 = vpack.c.bf16 %v857_v49, %v855_v47 }
 0x221   : > { %872 = vmatpush.bf16.msrb.mxu2 %v860_v52  ;;  %885 = vmatpush.bf16.msrb.mxu3 %v861_v53 }
 0x225   : > { %873 = vmatpush.bf16.msrb.mxu2 %v858_v56  ;;  %886 = vmatpush.bf16.msrb.mxu3 %v859_v57 }
 0x228   : > { %1098 = vmatmul.msk.bf16.vlgmr.msrb.gmra.mxu2 %vm679_vm4, %v862_v58  ;;  %1099 = vmatmul.msk.bf16.vlgmr.msrb.gmra.mxu3 %vm679_vm4, %v862_v58 }
 0x2ab   : > { %v875_v63 = vpop.f32.mrf.mxu2  ;;  %v888_v0 = vpop.f32.mrf.mxu3 }
 0x2ac   : > { %v876_v1 = vadd.f32 %v875_v63, %v512_v59  ;;  %v889_v2 = vadd.f32 %v888_v0, %v555_v60 }
 0x2ae   : > { %v897_v4 = vadd.f32 %v895_v3, %v876_v1  ;;  %v898_v5 = vadd.f32 %v895_v3, %v889_v2 }
 0x2b0   : > { %899 = vst [vmem:[%s349_s12] sm:$0xff] %v897_v4 }
 0x2b1   : > { %900 = vst [vmem:[%s349_s12 + $0x8] sm:$0xff] %v898_v5 }
 0x2b2   : > { %1206 = shalt.err (!%p1203_p5)
}
 0x2b3   : > { %1120 = dma.vmem_to_hbm [thread:$0]  (%p1345_p4), %s918_s14, 256, %s920_s16, %s902_s30   ;;  %v877_v6 = vpop.f32.mrf.mxu2  ;;  %v890_v7 = vpop.f32.mrf.mxu3 }
 0x2b4 PF: > { %p1126_p6 = scmp.ge.s32.totalorder %s1257_s10, 2  ;;  %s931_s21 = sand.u32 1, %s1237_s27  }
 0x2b5   : > { %s932_s11 = scalar_lea.sflag [#allocation3], %s931_s21 }
 0x2b6   : > { %p1123_p7 = pnand %p1126_p6, %p1352_p8 }
 0x2b8   : > { %p1124_p9 = pneg %p1123_p7 }
 0x2ba   : > { %1232 = dma.done.wait (%p1124_p9), %s932_s11, 256  }
 0x2bb   : > { %1234 = vsyncadd (%p1124_p9), %s932_s11, 4294967040  ;;  %s21_s10 = sadd.s32 1, %s1257_s10   ;;  %s1525_s27 = smov %s1241_s28 }
 0x2bc   : > { %p18_p10 = scmp.ge.s32.totalorder %s21_s10, 4   ;;  %s1526_s28 = smov %s1245_s29 }
 0x2bd   : > { %s1527_s29 = smov %s1358_s18  ;;  %s1528_s30 = smov %s1253_s9 }
 0x2be   : > { %s1529_s9 = smov %s1531_s13  ;;  %20 = sbr.rel (!%p18_p10) target bundleno = 4 (0x4), region = 90 }
 0x2c3   :  { %938 = vsyncpa [#allocation3], 1 }
 0x2c4   :  { %940 = vsyncpa [#allocation3 + $0x1], 1 }

</bundles_post_ra>
